<compile_context>
chip_gen: v7x
topology: tpu7x:2x2x1
jax: 0.10.0
libtpu: 0.0.40
codegen_flags: <defaults>
</compile_context>

<pallas_src>
import jax
import jax.numpy as jnp
from jax.experimental import pallas as pl
from jax.experimental.pallas import tpu as pltpu


def _round_up(x, m):
    return ((x + m - 1) // m) * m


def _pad_to(x, shape):
    return jnp.pad(x, [(0, s - d) for d, s in zip(x.shape, shape)])


def _tpu_budget():
    """Per-generation (vmem_limit_bytes, row-tile size)."""
    try:
        cap = int(pltpu.get_tpu_info().vmem_capacity_bytes)
    except Exception:
        cap = 64 * 1024 * 1024                      # conservative (v7x-sized)
    vmem_limit = int(cap * 4 // 5)                  # ~102 MiB v5e/v6e, ~51 MiB v7x
    tm = 512 if cap >= 100 * 1024 * 1024 else 256   # v5e/v6e : v7x
    return vmem_limit, tm


# ---------------------------------------------------------------------------
# Kernel 1: H0 = relu(x @ W0 + b0), padded rows zeroed.
# ---------------------------------------------------------------------------
def _make_lin0_kernel(n_valid, tm):
    def kernel(x_ref, w_ref, b_ref, h_ref):
        i = pl.program_id(0)
        h = jnp.dot(x_ref[...], w_ref[...], preferred_element_type=jnp.float32)
        h = jnp.maximum(h + b_ref[...], 0.0)
        # Zero padded rows so downstream (L@H0, pooling) never sees relu(b0).
        rows = i * tm + jax.lax.broadcasted_iota(jnp.int32, h.shape, 0)
        h = jnp.where(rows < n_valid, h, 0.0)
        h_ref[...] = h.astype(h_ref.dtype)
    return kernel


def lin0_forward(x_pad, w0, b0, *, n_valid, tm, vmem_limit):
    Np, Fp = x_pad.shape
    Dp = w0.shape[1]
    return pl.pallas_call(
        _make_lin0_kernel(n_valid, tm),
        out_shape=jax.ShapeDtypeStruct((Np, Dp), jnp.bfloat16),
        grid_spec=pltpu.PrefetchScalarGridSpec(
            num_scalar_prefetch=0,
            grid=(Np // tm,),
            in_specs=[
                pl.BlockSpec((tm, Fp), lambda i: (i, 0)),
                pl.BlockSpec((Fp, Dp), lambda i: (0, 0),
                             pipeline_mode=pl.Buffered(1)),   # W0 (resident)
                pl.BlockSpec((1, Dp), lambda i: (0, 0),
                             pipeline_mode=pl.Buffered(1)),   # b0 (f32)
            ],
            out_specs=pl.BlockSpec((tm, Dp), lambda i: (i, 0)),
        ),
        compiler_params=pltpu.CompilerParams(
            dimension_semantics=("parallel",),
            vmem_limit_bytes=vmem_limit,
        ),
    )(x_pad, w0, b0)


# ---------------------------------------------------------------------------
# Kernel 2: ChebConv(K=2, sym) + ReLU + global_add_pool, k-tiled and
# zero-block-skipping.
#   T0 = H0,  T1 = L_hat @ H0
#   H1 = relu(T0 @ Wc0 + T1 @ Wc1 + bc)
#   pooled[c] += P @ H1   (per-core partial, summed in wrapper)
# ---------------------------------------------------------------------------
def cheb_pool_forward(h0, l_p, wc0, wc1, bc, p_p, kstart, kend, *,
                      tm, tk, num_splits, vmem_limit):
    Np, Dp = h0.shape
    Gp = p_p.shape[0]
    n_row = Np // tm
    npc = n_row // num_splits
    n_k = Np // tk

    def _row(c, i):
        return c * npc + i

    def _clamped_k(k, row, ks_ref, ke_ref):
        ks = ks_ref[row]
        ke = ke_ref[row]
        # Clamp into the nonzero block range: outside it the block index is
        # repeated, so no new DMA is issued for all-zero L / unused H0 blocks.
        return jnp.minimum(jnp.maximum(k, ks), jnp.maximum(ke, ks))

    def h0_row_map(c, i, k, ks_ref, ke_ref):
        return (_row(c, i), 0)

    def h0_k_map(c, i, k, ks_ref, ke_ref):
        return (_clamped_k(k, _row(c, i), ks_ref, ke_ref), 0)

    def l_map(c, i, k, ks_ref, ke_ref):
        row = _row(c, i)
        return (row, _clamped_k(k, row, ks_ref, ke_ref))

    def const_map(c, i, k, ks_ref, ke_ref):
        return (0, 0)

    def p_map(c, i, k, ks_ref, ke_ref):
        return (0, _row(c, i))

    def h1_map(c, i, k, ks_ref, ke_ref):
        return (_row(c, i), 0)

    def pool_map(c, i, k, ks_ref, ke_ref):
        return (c, 0, 0)

    def kernel(ks_ref, ke_ref, h0_row_ref, h0_k_ref, l_ref, wc0_ref, wc1_ref,
               bc_ref, p_ref, h1_ref, pool_ref, t1_acc):
        c = pl.program_id(0)
        i = pl.program_id(1)
        k = pl.program_id(2)
        row = c * npc + i

        @pl.when(jnp.logical_and(i == 0, k == 0))
        def _():
            pool_ref[...] = jnp.zeros_like(pool_ref)

        @pl.when(k == 0)
        def _():
            t1_acc[...] = jnp.zeros_like(t1_acc)

        ks = ks_ref[row]
        ke = ke_ref[row]

        # Chebyshev propagate, accumulated over nonzero k-blocks only.
        @pl.when(jnp.logical_and(k >= ks, k <= ke))
        def _():
            t1_acc[...] += jnp.dot(l_ref[...], h0_k_ref[...],
                                   preferred_element_type=jnp.float32)

        # Epilogue: Cheb combine + bias + ReLU + pooled accumulation.
        @pl.when(k == pl.num_programs(2) - 1)
        def _():
            out = jnp.dot(h0_row_ref[...], wc0_ref[...],
                          preferred_element_type=jnp.float32)
            out = out + jnp.dot(t1_acc[...].astype(jnp.bfloat16), wc1_ref[...],
                                preferred_element_type=jnp.float32)
            out = jnp.maximum(out + bc_ref[...], 0.0)
            out_bf16 = out.astype(jnp.bfloat16)
            h1_ref[...] = out_bf16
            # bf16 x bf16 MXU path, f32 accumulate into the resident block.
            pool_ref[...] += jnp.dot(p_ref[...], out_bf16,
                                     preferred_element_type=jnp.float32)[None]

    return pl.pallas_call(
        kernel,
        out_shape=(
            jax.ShapeDtypeStruct((Np, Dp), jnp.bfloat16),            # per-node
            jax.ShapeDtypeStruct((num_splits, Gp, Dp), jnp.float32),  # per-core pooled
        ),
        grid_spec=pltpu.PrefetchScalarGridSpec(
            num_scalar_prefetch=2,
            grid=(num_splits, npc, n_k),
            in_specs=[
                pl.BlockSpec((tm, Dp), h0_row_map),      # T0 row tile (bf16)
                pl.BlockSpec((tk, Dp), h0_k_map),        # H0 k-block (bf16)
                # TODO(synk): sweep pipeline_mode=pl.Buffered(3) here once the
                # kernel is confirmed DMA-exposed at production sizes.
                pl.BlockSpec((tm, tk), l_map),           # L_hat block (bf16)
                pl.BlockSpec((Dp, Dp), const_map,
                             pipeline_mode=pl.Buffered(1)),  # Wc0 (resident)
                pl.BlockSpec((Dp, Dp), const_map,
                             pipeline_mode=pl.Buffered(1)),  # Wc1 (resident)
                pl.BlockSpec((1, Dp), const_map,
                             pipeline_mode=pl.Buffered(1)),  # bias (f32)
                pl.BlockSpec((Gp, tm), p_map),           # pooling one-hot cols (bf16)
            ],
            out_specs=(
                pl.BlockSpec((tm, Dp), h1_map),
                pl.BlockSpec((1, Gp, Dp), pool_map),     # per-core accumulator
            ),
            scratch_shapes=[pltpu.VMEM((tm, Dp), jnp.float32)],      # t1 accumulator
        ),
        compiler_params=pltpu.CompilerParams(
            dimension_semantics=("parallel", "arbitrary", "arbitrary"),
            vmem_limit_bytes=vmem_limit,
        ),
    )(kstart, kend, h0, h0, l_p, wc0, wc1, bc, p_p)


# ---------------------------------------------------------------------------
# Wrapper: builds dense graph operators, pads to TPU-friendly shapes, runs the
# two kernels, slices the padding back off.
# ---------------------------------------------------------------------------
def pyencoder_forward(x, edge_index, batch, num_graphs,
                      w0, b0, wc0, wc1, bc, *, tm=None, num_core_splits=2):
    N, F = x.shape
    D = w0.shape[1]

    vmem_limit, tm_auto = _tpu_budget()
    if tm is None:
        tm = tm_auto
    tk = tm

    # ChebConv(K=2, 'sym', lambda_max=None -> 2.0):  L_hat = -D^{-1/2} A D^{-1/2}
    # TODO(synk): rebuild l_hat if normalization='rw' or an explicit lambda_max
    # is ever passed to the module.
    A = jnp.zeros((N, N), jnp.float32).at[edge_index[0], edge_index[1]].add(1.0)
    deg = A.sum(axis=1)
    dinv = jnp.where(deg > 0, jax.lax.rsqrt(jnp.maximum(deg, 1e-12)), 0.0)
    l_hat = -(dinv[:, None] * A * dinv[None, :])

    # global_add_pool as a one-hot (graphs x nodes) matmul (0/1 exact in bf16).
    P = (batch[None, :] == jnp.arange(num_graphs)[:, None])

    # Pad to lane/MXU friendly sizes; node rows padded so both core splits and
    # row tiles divide evenly.
    Np = _round_up(max(N, 1), num_core_splits * tm)
    Fp = _round_up(F, 128)
    Dp = _round_up(D, 128)
    Gp = _round_up(num_graphs, 8)
    n_row = Np // tm
    n_k = Np // tk

    x_p = _pad_to(x, (Np, Fp)).astype(jnp.bfloat16)
    w0_p = _pad_to(w0, (Fp, Dp)).astype(jnp.bfloat16)
    b0_p = _pad_to(b0.reshape(1, -1), (1, Dp))               # f32
    wc0_p = _pad_to(wc0, (Dp, Dp)).astype(jnp.bfloat16)
    wc1_p = _pad_to(wc1, (Dp, Dp)).astype(jnp.bfloat16)
    bc_p = _pad_to(bc.reshape(1, -1), (1, Dp))               # f32
    l_f32 = _pad_to(l_hat, (Np, Np))
    p_p = _pad_to(P, (Gp, Np)).astype(jnp.bfloat16)

    # Per-row-tile first/last nonzero k-block of L_hat (scalar prefetch).
    blk_nz = jnp.abs(l_f32).reshape(n_row, tm, n_k, tk).sum(axis=(1, 3)) > 0.0
    any_nz = blk_nz.any(axis=1)
    kstart = jnp.where(any_nz, jnp.argmax(blk_nz, axis=1), 0).astype(jnp.int32)
    kend = jnp.where(any_nz,
                     n_k - 1 - jnp.argmax(blk_nz[:, ::-1], axis=1),
                     -1).astype(jnp.int32)
    l_p = l_f32.astype(jnp.bfloat16)

    h0 = lin0_forward(x_p, w0_p, b0_p, n_valid=N, tm=tm, vmem_limit=vmem_limit)
    h1_p, pooled_p = cheb_pool_forward(
        h0, l_p, wc0_p, wc1_p, bc_p, p_p, kstart, kend,
        tm=tm, tk=tk, num_splits=num_core_splits, vmem_limit=vmem_limit)

    # forward returns (global_add_pool(out, batch), feat_map[-1])
    pooled = pooled_p.sum(axis=0)[:num_graphs, :D]
    feat = h1_p[:N, :D].astype(jnp.float32)
    return pooled, feat


# ---------------------------------------------------------------------------
# Pure-JAX f32 reference (PyTorch semantics)
# ---------------------------------------------------------------------------
def pyencoder_reference(x, edge_index, batch, num_graphs, w0, b0, wc0, wc1, bc):
    N = x.shape[0]
    A = jnp.zeros((N, N), jnp.float32).at[edge_index[0], edge_index[1]].add(1.0)
    deg = A.sum(axis=1)
    dinv = jnp.where(deg > 0, jax.lax.rsqrt(jnp.maximum(deg, 1e-12)), 0.0)
    l_hat = -(dinv[:, None] * A * dinv[None, :])
    h0 = jnp.maximum(x @ w0 + b0, 0.0)
    t1 = l_hat @ h0
    h1 = jnp.maximum(h0 @ wc0 + t1 @ wc1 + bc, 0.0)
    P = (batch[None, :] == jnp.arange(num_graphs)[:, None]).astype(jnp.float32)
    return P @ h1, h1


if __name__ == "__main__":
    # Small shapes consistent with the module: 2 graphs x 8 nodes, 16 features,
    # hidden dim 32.
    num_features, dim = 16, 32
    nodes_per_graph, num_graphs = 8, 2
    N = nodes_per_graph * num_graphs

    key = jax.random.PRNGKey(0)
    kx, k0, kb0, kc0, kc1, kbc = jax.random.split(key, 6)

    x = jax.random.normal(kx, (N, num_features), dtype=jnp.float32)

    # Deterministic undirected graph: a ring inside each graph.
    src, dst = [], []
    for g in range(num_graphs):
        base = g * nodes_per_graph
        for v in range(nodes_per_graph):
            u, w = base + v, base + (v + 1) % nodes_per_graph
            src += [u, w]
            dst += [w, u]
    edge_index = jnp.array([src, dst], dtype=jnp.int32)
    batch = jnp.repeat(jnp.arange(num_graphs, dtype=jnp.int32), nodes_per_graph)

    # Parameters, stored as (in, out) so kernels compute y = x @ W + b.
    def uniform(k, shape, fan_in):
        bound = 1.0 / (fan_in ** 0.5)
        return jax.random.uniform(k, shape, jnp.float32, -bound, bound)

    w0 = uniform(k0, (num_features, dim), num_features)
    b0 = uniform(kb0, (dim,), num_features)
    wc0 = uniform(kc0, (dim, dim), dim)
    wc1 = uniform(kc1, (dim, dim), dim)
    bc = uniform(kbc, (dim,), dim)

    pooled, feat = pyencoder_forward(x, edge_index, batch, num_graphs,
                                     w0, b0, wc0, wc1, bc)
    pooled, feat = jax.block_until_ready((pooled, feat))

    pooled_ref, feat_ref = pyencoder_reference(x, edge_index, batch, num_graphs,
                                               w0, b0, wc0, wc1, bc)

    assert pooled.shape == (num_graphs, dim)
    assert feat.shape == (N, dim)
    # bf16 operands / bf16 feature writeback with f32 accumulation vs f32
    # reference -> loose tolerance.
    assert jnp.allclose(pooled, pooled_ref, atol=5e-2, rtol=5e-2)
    assert jnp.allclose(feat, feat_ref, atol=5e-2, rtol=5e-2)
    print("KERNEL_OK")
</pallas_src>

<mosaic_0001>
module attributes {stable_mosaic.version = 11 : i64} {
  func.func @kernel(%arg0: i32, %arg1: memref<256x128xbf16, #tpu.memory_space<vmem>>, %arg2: memref<128x128xbf16, #tpu.memory_space<vmem>>, %arg3: memref<1x128xf32, #tpu.memory_space<vmem>>, %arg4: memref<256x128xbf16, #tpu.memory_space<vmem>>) attributes {dimension_semantics = [#tpu.dimension_semantics<parallel>], iteration_bounds = array<i64: 2>, scalar_prefetch = 0 : i64, scratch_operands = 0 : i64, tpu.core_type = #tpu.core_type<tc>, window_params = [{transform_indices = @transform_0, window_bounds = array<i64: 256, 128>}, {pipeline_mode = #tpu.pipeline_mode<synchronous>, transform_indices = @transform_1, window_bounds = array<i64: 128, 128>}, {pipeline_mode = #tpu.pipeline_mode<synchronous>, transform_indices = @transform_2, window_bounds = array<i64: 1, 128>}, {transform_indices = @transform_3, window_bounds = array<i64: 256, 128>}]} {
    %c0 = arith.constant 0 : index
    %c0_0 = arith.constant 0 : index
    %0 = vector.load %arg1[%c0, %c0_0] : memref<256x128xbf16, #tpu.memory_space<vmem>>, vector<256x128xbf16>
    %c0_1 = arith.constant 0 : index
    %c0_2 = arith.constant 0 : index
    %1 = vector.load %arg2[%c0_1, %c0_2] : memref<128x128xbf16, #tpu.memory_space<vmem>>, vector<128x128xbf16>
    %cst = arith.constant dense<0.000000e+00> : vector<256x128xf32>
    %2 = tpu.matmul %0, %1, %cst {dimension_numbers = #tpu.dot_dimension_numbers<[1], [0], [0], [1], [0, 0, 1, 1], [], []>} : vector<256x128xbf16>, vector<128x128xbf16>, vector<256x128xf32> -> vector<256x128xf32>
    %c0_3 = arith.constant 0 : index
    %c0_4 = arith.constant 0 : index
    %3 = vector.load %arg3[%c0_3, %c0_4] : memref<1x128xf32, #tpu.memory_space<vmem>>, vector<1x128xf32>
    %4 = vector.broadcast %3 : vector<1x128xf32> to vector<256x128xf32>
    %5 = arith.addf %2, %4 : vector<256x128xf32>
    %cst_5 = arith.constant 0.000000e+00 : f32
    %6 = vector.broadcast %cst_5 : f32 to vector<256x128xf32>
    %7 = arith.maximumf %5, %6 : vector<256x128xf32>
    %c256_i32 = arith.constant 256 : i32
    %8 = arith.muli %arg0, %c256_i32 : i32
    %9 = tpu.iota {dimensions = array<i32: 0>} : vector<256x128xi32>
    %10 = vector.broadcast %8 : i32 to vector<256x128xi32>
    %11 = arith.addi %10, %9 : vector<256x128xi32>
    %c16_i32 = arith.constant 16 : i32
    %12 = vector.broadcast %c16_i32 : i32 to vector<256x128xi32>
    %13 = arith.cmpi slt, %11, %12 : vector<256x128xi32>
    %cst_6 = arith.constant 0.000000e+00 : f32
    %14 = vector.broadcast %cst_6 : f32 to vector<256x128xf32>
    %15 = arith.select %13, %7, %14 : vector<256x128xi1>, vector<256x128xf32>
    %16 = arith.truncf %15 : vector<256x128xf32> to vector<256x128xbf16>
    %c0_7 = arith.constant 0 : index
    %c0_8 = arith.constant 0 : index
    %17 = vector.load %arg4[%c0_7, %c0_8] : memref<256x128xbf16, #tpu.memory_space<vmem>>, vector<256x128xbf16>
    tpu.vector_store %arg4[%c0_7, %c0_8], %16 {strides = array<i32>} : memref<256x128xbf16, #tpu.memory_space<vmem>>, vector<256x128xbf16>,
    return
  }
  func.func @transform_0(%arg0: i32) -> (i32, i32) {
    %c0_i32 = arith.constant 0 : i32
    %c0_i32_0 = arith.constant 0 : i32
    return %arg0, %c0_i32 : i32, i32
  }
  func.func @transform_1(%arg0: i32) -> (i32, i32) {
    %c0_i32 = arith.constant 0 : i32
    %c0_i32_0 = arith.constant 0 : i32
    %c0_i32_1 = arith.constant 0 : i32
    return %c0_i32, %c0_i32_0 : i32, i32
  }
  func.func @transform_2(%arg0: i32) -> (i32, i32) {
    %c0_i32 = arith.constant 0 : i32
    %c0_i32_0 = arith.constant 0 : i32
    %c0_i32_1 = arith.constant 0 : i32
    return %c0_i32, %c0_i32_0 : i32, i32
  }
  func.func @transform_3(%arg0: i32) -> (i32, i32) {
    %c0_i32 = arith.constant 0 : i32
    %c0_i32_0 = arith.constant 0 : i32
    return %arg0, %c0_i32 : i32, i32
  }
}

</mosaic_0001>

<bundles_post_ra>
// kernel: tpu_custom_call.1
= control target key start
LH: loop header
LB: loop body
LE: loop exit
PB: predicated region body
PF: predicated region fallthrough
CT: control target
= control target key end

     0   :  { %8 = vsyncpa [#allocation3], 0  ;;  %s2030_s0 = inlined_call_operand.hbm [shape: bf16[512,128], index: 0, kind: input, shape index: {}]   ;;  %s2031_s1 = inlined_call_operand.hbm [shape: bf16[128,128], index: 1, kind: input, shape index: {}]   ;;  %s2032_s2 = inlined_call_operand.vmem [shape: f32[1,128], index: 2, kind: input, shape index: {}]   ;;  %s2033_s3 = inlined_call_operand.hbm [shape: bf16[512,128], index: 3, kind: output, shape index: {}]  }
   0x1   :  { %10 = vsyncpa [#allocation3 + $0x1], 0 }
   0x2   :  { %11 = vsyncpa [#allocation6], 0 }
   0x3   :  { %12 = vsyncpa [#allocation4], 0 }
   0x4   :  { %14 = vsyncpa [#allocation4 + $0x1], 0  ;;  %s1520_s12 = smov 0   ;;  %s1522_s13 = smov 0  }
   0x5   :  { %s1524_s14 = smov 0   ;;  %s1526_s15 = smov 0  }
   0x6 LB: > { %s1541_s16 = sadd.s32 4294967295, %s1491_s15   ;;  %s987_s17 = sadd.s32 4294967294, %s1491_s15   ;;  %s1491_s15 = sphi %s1526_s15, %s2053_s15   ;;  %s1487_s14 = sphi %s1524_s14, %s2052_s14   ;;  %s1483_s13 = sphi %s1522_s13, %s2051_s13   ;;  %s1479_s12 = sphi %s1520_s12, %s2050_s12  }
   0x7   : > { %p40_p0 = scmp.ne.s32.totalorder %s1483_s13, %s1479_s12  ;;  %p2034_p1 = scmp.eq.s32.totalorder %s1541_s16, 0 }
   0x8   : > { %p112_p3 = scmp.eq.s32.totalorder %s987_s17, 1  ;;  %p988_p5 = scmp.ge.s32.totalorder %s1491_s15, 1 }
   0x9   : > { %p1550_p4 = por %p2034_p1, %p40_p0  ;;  %p119_p7 = scmp.lt.s32.totalorder %s1491_s15, 3 }
   0xa   : > { %p1555_p6 = por %p112_p3, %p40_p0  ;;  %s1493_s21 = smov [#allocation5]  }
   0xb   : > { %s2037_s18 = scalar_select %p1550_p4, 1, 0 }
   0xc   : > { %s2038_s19 = scalar_select %p1555_p6, 1, 0 }
   0xd   : > { %p1560_p8 = pnand %p988_p5, %p119_p7  ;;  %s131_s22 = sshll.u32 %s1493_s21, 4  ;;  %s1564_s22 = int_to_ptr.vmem [resolvable:$true] %s131_s22 }
   0xe   : > { %s1576_s24 = sadd.s32 1, %s1491_s15   ;;  %s27_s25 = sadd.s32 1, %s1487_s14 }
   0xf   : > { %s2039_s20 = scalar_select %p1560_p8, 1, 0 }
  0x10   : > { %p1286_p9 = pneg %p1560_p8  ;;  %s24_s26 = ssub.s32 %s1491_s15, %s1576_s24 }
  0x11   : > { %s1363_s29 = scalar_lea.hbm %s2031_s1, 1024 }
  0x12   : > { %p1571_p11 = pnand %p1286_p9, %p2034_p1  ;;  %p1364_p12 = scmp.ne.s32.totalorder %s2031_s1, %s1363_s29 }
  0x13   : > { %p1370_p5 = scmp.lt.u32.totalorder %s1363_s29, %s2031_s1 }
  0x14   : > { %p1365_p13 = pneg %p1571_p11 }
  0x16   : > { %p1366_p0 = pnand %p1365_p13, %p1364_p12 }
  0x18   : > { %p1367_p3 = pneg %p1366_p0 }
  0x1a   : > { %p1372_p7 = pnand %p1370_p5, %p1367_p3 }
  0x1c   : > { %1375 = shalt.err (!%p1372_p7)
}
  0x1d   : > { %s1376_s7 = scalar_lea.vmem %s1564_s22, 1024  ;;  %p1384_p2 = scmp.lt.s32.totalorder %s1564_s22, %s1564_s22 }
  0x1e   : > { %p1377_p9 = scmp.ne.s32.totalorder %s1564_s22, %s1376_s7  ;;  %p1385_p6 = scmp.lt.s32.totalorder %s1376_s7, %s1376_s7 }
  0x20   : > { %p1379_p10 = pnand %p1377_p9, %p1365_p13  ;;  %p1386_p4 = por %p1385_p6, %p1384_p2 }
  0x22   : > { %p1380_p1 = pneg %p1379_p10 }
  0x24   : > { %p1387_p8 = pnand %p1386_p4, %p1380_p1 }
  0x26   : > { %1390 = shalt.err (!%p1387_p8)
}
  0x27   : > { %s1494_s8 = smov 64   ;;  %s1495_s9 = smov 4  }
  0x28   : > { %1289 = dma.hbm_to_vmem [thread:$0]  (!%p1571_p11), %s2031_s1, 1024, %s1564_s22, [#allocation6], %s1494_s8, %s1494_s8, %s1495_s9  }
  0x29   : > { %p25_p1 = scmp.eq.s32.totalorder %s24_s26, 0  ;;  %p34_p2 = scmp.ne.s32.totalorder %s1487_s14, %s1483_s13 }
  0x2a   : > { %p35_p4 = scmp.eq.s32.totalorder %s1491_s15, 0  ;;  %p1299_p6 = scmp.lt.s32.totalorder %s1491_s15, 2 }
  0x2b   : > { %s1610_s17 = scalar_select %p25_p1, %s1487_s14, %s27_s25  }
  0x2c   : > { %p36_p8 = por %p35_p4, %p34_p2  ;;  %p2041_p10 = scmp.eq.s32.totalorder %s1541_s16, 1 }
  0x2d   : > { %s148_s23 = sand.u32 1, %s1487_s14   ;;  %s1061_s27 = sshll.u32 %s1491_s15, 11 }
  0x2e   : > { %p1614_p12 = por %p2041_p10, %p34_p2  ;;  %s991_s28 = sshll.u32 %s148_s23, 7 }
  0x2f   : > { %s1623_s4 = scalar_lea.hbm %s2030_s0, %s1061_s27  ;;  %s152_s22 = scalar_lea.vmem [#allocation2], %s991_s28 }
  0x30   : > { %s159_s25 = sshll.u32 %s152_s22, 4  ;;  %p1625_p11 = pnand %p1299_p6, %p36_p8  ;;  %s1629_s25 = int_to_ptr.vmem [resolvable:$true] %s159_s25 }
  0x31   : > { %s1631_s5 = scalar_lea.sflag [#allocation3], %s148_s23  ;;  %s1391_s6 = scalar_lea.hbm %s1623_s4, 2048 }
  0x32   : > { %p1392_p13 = scmp.ne.s32.totalorder %s1623_s4, %s1391_s6  ;;  %p1393_p0 = pneg %p1625_p11 }
  0x33   : > { %s1396_s11 = scalar_lea.hbm %s2030_s0, 4096  ;;  %p1397_p7 = scmp.lt.u32.totalorder %s1623_s4, %s2030_s0 }
  0x34   : > { %p1394_p3 = pnand %p1393_p0, %p1392_p13  ;;  %p1398_p9 = scmp.lt.u32.totalorder %s1396_s11, %s1391_s6 }
  0x35   : > { %p1400_p2 = scmp.lt.u32.totalorder %s1391_s6, %s1623_s4 }
  0x36   : > { %p1395_p5 = pneg %p1394_p3  ;;  %p1399_p1 = por %p1398_p9, %p1397_p7 }
  0x38   : > { %p1401_p4 = por %p1400_p2, %p1399_p1 }
  0x3a   : > { %p1402_p6 = pnand %p1401_p4, %p1395_p5 }
  0x3c   : > { %1405 = shalt.err (!%p1402_p6)
}
  0x3d   : > { %s1406_s23 = scalar_lea.vmem %s1629_s25, 2048  ;;  %s1496_s29 = smov [#allocation2]  }
  0x3e   : > { %p1407_p8 = scmp.ne.s32.totalorder %s1629_s25, %s1406_s23  ;;  %s1411_s30 = sshll.u32 %s1496_s29, 4  ;;  %s1412_s30 = int_to_ptr.vmem [resolvable:$false] %s1411_s30 }
  0x3f   : > { %s1413_s22 = scalar_lea.vmem %s1412_s30, 4096  ;;  %p1414_p3 = scmp.lt.s32.totalorder %s1629_s25, %s1412_s30 }
  0x40   : > { %p1409_p10 = pnand %p1407_p8, %p1393_p0  ;;  %p1415_p7 = scmp.lt.s32.totalorder %s1413_s22, %s1406_s23 }
  0x42   : > { %p1410_p13 = pneg %p1409_p10  ;;  %p1416_p9 = por %p1415_p7, %p1414_p3 }
  0x44   : > { %p1417_p1 = pnand %p1416_p9, %p1410_p13 }
  0x46   : > { %1420 = shalt.err (!%p1417_p1)
}
  0x47   : > { %1293 = dma.hbm_to_vmem [thread:$0]  (!%p1625_p11), %s1623_s4, 2048, %s1629_s25, %s1631_s5, %s1494_s8, %s1494_s8, %s1495_s9  }
  0x48   : > { %p2044_p0 = scmp.ne.s32.totalorder %s2039_s20, 0 }
  0x49   : > { %s1665_s6 = sand.u32 (!%p2044_p0), 1, %s1483_s13   ;;  %p2045_p5 = scmp.ne.s32.totalorder (!%p2044_p0), %s2037_s18, 0 }
  0x4a   : > { %171 = sbr.rel (%p2044_p0) target bundleno = 382 (0x17e), region = 32  ;;  %s995_s7 = sshll.u32 (!%p2044_p0), %s1665_s6, 7 }
  0x4b   : > { %s174_s10 = scalar_lea.sflag (!%p2044_p0), [#allocation3], %s1665_s6  ;;  %s1671_s26 = scalar_lea.vmem (!%p2044_p0), [#allocation2], %s995_s7 }
  0x51   : > { %1466 = dma.done.wait (%p2045_p5), %s174_s10, 2048  }
  0x52   : > { %1468 = vsyncadd (%p2045_p5), %s174_s10, 4294965248  ;;  %p2046_p11 = scmp.eq.s32.totalorder %s1541_s16, 0 }
  0x54   : > { %1470 = dma.done.wait (%p2046_p11), [#allocation6], 1024   ;;  %p2047_p2 = pmov %p2046_p11 }
  0x55   : > { %v1339_v0 = vld [vmem:[#allocation5] sm:$0xff]   ;;  %v1340_v1 = vld [vmem:[#allocation5 + $0x8] sm:$0xff]   ;;  %v1341_v2 = vld [vmem:[#allocation5 + $0x10] sm:$0xff]   ;;  %v600_v24 = vlaneseq  ;;  %s1023_s18 = sshll.u32 %s1541_s16, 8  ;;  %s1863_s9 = scalar_lea.vmem [#allocation7], %s995_s7 }
  0x56   : > { %1472 = vsyncadd (%p2047_p2), [#allocation6], 4294966272  ;;  %1214 = vmatprep.subr.bf16.mxu0 %v1339_v0  ;;  %1262 = vmatprep.subr.bf16.mxu1 %v1339_v0  ;;  %v1342_v3 = vld [vmem:[#allocation5 + $0x18] sm:$0xff]   ;;  %v1347_v4 = vld [vmem:[%s1671_s26] sm:$0xff]   ;;  %v1701_v27 = vstv %s1023_s18  ;;  %s1094_s4 = sshll.u32 %s1541_s16, 11  ;;  %s904_s25 = sshll.u32 %s1863_s9, 4  ;;  %s1982_s25 = int_to_ptr.vmem [resolvable:$true] %s904_s25 }
  0x57   : > { %1215 = vmatpush3.bf16.msra.mxu0 %v1339_v0  ;;  %1270 = vmatpush3.bf16.msra.mxu1 %v1339_v0  ;;  %v1348_v5 = vld [vmem:[%s1671_s26 + $0x40] sm:$0xff]   ;;  %v1344_v7 = vld [vmem:[#allocation5 + $0x28] sm:$0xff]   ;;  %v1345_v8 = vld [vmem:[#allocation5 + $0x30] sm:$0xff]   ;;  %v1697_v25 = vshrl.u32 %v600_v24, 7  ;;  %s1980_s11 = scalar_lea.hbm %s2033_s3, %s1094_s4  ;;  %s891_s27 = scalar_lea.sflag [#allocation4], %s1665_s6 }
  0x58   : > { %1216 = vmatprep.subr.bf16.mxu0 %v1340_v1  ;;  %1263 = vmatprep.subr.bf16.mxu1 %v1340_v1  ;;  %v1343_v6 = vld [vmem:[#allocation5 + $0x20] sm:$0xff]   ;;  %v1346_v9 = vld [vmem:[#allocation5 + $0x38] sm:$0xff]   ;;  %v1349_v10 = vld [vmem:[%s1671_s26 + $0x8] sm:$0xff]   ;;  %s1421_s28 = scalar_lea.vmem %s1982_s25, 2048  ;;  %s1497_s23 = smov [#allocation7]  }
  0x59   : > { %1230 = vmatprep.mubr.bf16.mxu0 %v1347_v4  ;;  %1246 = vmatprep.mubr.bf16.mxu1 %v1348_v5  ;;  %v1350_v11 = vld [vmem:[%s1671_s26 + $0x48] sm:$0xff]   ;;  %v1351_v12 = vld [vmem:[%s1671_s26 + $0x10] sm:$0xff]   ;;  %v1353_v14 = vld [vmem:[%s1671_s26 + $0x18] sm:$0xff]   ;;  %v603_v26 = vadd.s32 16, %v1697_v25  ;;  %v619_v28 = vadd.s32 144, %v1697_v25  ;;  %v617_v29 = vadd.s32 128, %v1697_v25  ;;  %v1719_v38 = vadd.s32 %v1701_v27, %v1697_v25  ;;  %p1422_p4 = scmp.ne.s32.totalorder %s1982_s25, %s1421_s28 }
  0x5a   : > { %v1352_v13 = vld [vmem:[%s1671_s26 + $0x50] sm:$0xff]   ;;  %v1354_v15 = vld [vmem:[%s1671_s26 + $0x58] sm:$0xff]   ;;  %v1355_v16 = vld [vmem:[%s1671_s26 + $0x20] sm:$0xff]   ;;  %v604_v30 = vadd.s32 24, %v1697_v25  ;;  %v620_v31 = vadd.s32 152, %v1697_v25  ;;  %v602_v32 = vadd.s32 8, %v1697_v25 }
  0x5b   : > { %1217 = vmatpush3.bf16.msra.mxu0 %v1340_v1  ;;  %1271 = vmatpush3.bf16.msra.mxu1 %v1340_v1  ;;  %v1356_v17 = vld [vmem:[%s1671_s26 + $0x60] sm:$0xff]   ;;  %v1357_v18 = vld [vmem:[%s1671_s26 + $0x28] sm:$0xff]   ;;  %v1359_v20 = vld [vmem:[%s1671_s26 + $0x30] sm:$0xff]   ;;  %v618_v33 = vadd.s32 136, %v1697_v25  ;;  %v607_v34 = vadd.s32 48, %v1697_v25  ;;  %v623_v35 = vadd.s32 176, %v1697_v25  ;;  %v1712_v36 = vadd.s32 %v1701_v27, %v603_v26  ;;  %p1423_p6 = pnand %p1422_p4, %p1614_p12 }
  0x5c   : > { %1218 = vmatprep.subr.bf16.mxu0 %v1341_v2  ;;  %1264 = vmatprep.subr.bf16.mxu1 %v1341_v2  ;;  %v1358_v19 = vld [vmem:[%s1671_s26 + $0x68] sm:$0xff]   ;;  %v1360_v21 = vld [vmem:[%s1671_s26 + $0x70] sm:$0xff]   ;;  %v1361_v22 = vld [vmem:[%s1671_s26 + $0x38] sm:$0xff]   ;;  %v1715_v37 = vadd.s32 %v1701_v27, %v619_v28  ;;  %v1722_v39 = vadd.s32 %v1701_v27, %v617_v29  ;;  %v1725_v40 = vadd.s32 %v1701_v27, %v604_v30  ;;  %v605_v44 = vadd.s32 32, %v1697_v25  ;;  %s1425_s29 = sshll.u32 %s1497_s23, 4  ;;  %s1426_s29 = int_to_ptr.vmem [resolvable:$false] %s1425_s29 }
  0x5d   : > { %v1362_v23 = vld [vmem:[%s1671_s26 + $0x78] sm:$0xff]   ;;  %v1728_v41 = vadd.s32 %v1701_v27, %v620_v31  ;;  %v1731_v42 = vadd.s32 %v1701_v27, %v602_v32  ;;  %v1734_v43 = vadd.s32 %v1701_v27, %v618_v33  ;;  %v621_v45 = vadd.s32 160, %v1697_v25  ;;  %v1779_v0 = vld [vmem:[%s2032_s2] ss:$0 sm:$0xff]  ;;  %p1424_p8 = pneg %p1423_p6  ;;  %s1427_s30 = scalar_lea.vmem %s1426_s29, 4096 }
  0x5e   : > { %v608_v46 = vadd.s32 56, %v1697_v25  ;;  %v624_v47 = vadd.s32 184, %v1697_v25  ;;  %v1741_v48 = vadd.s32 %v1701_v27, %v607_v34  ;;  %v1744_v49 = vadd.s32 %v1701_v27, %v623_v35  ;;  %p1428_p10 = scmp.lt.s32.totalorder %s1982_s25, %s1426_s29  ;;  %p1429_p13 = scmp.lt.s32.totalorder %s1427_s30, %s1421_s28 }
  0x5f   : > { %1219 = vmatpush3.bf16.msra.mxu0 %v1341_v2  ;;  %1272 = vmatpush3.bf16.msra.mxu1 %v1341_v2  ;;  %v606_v50 = vadd.s32 40, %v1697_v25  ;;  %v622_v51 = vadd.s32 168, %v1697_v25  ;;  %vm668_vm0 = vcmp.lt.s32.totalorder %v1712_v36, 16  ;;  %vm684_vm1 = vcmp.lt.s32.totalorder %v1715_v37, 16 }
  0x60   : > { %1220 = vmatprep.subr.bf16.mxu0 %v1342_v3  ;;  %1265 = vmatprep.subr.bf16.mxu1 %v1342_v3  ;;  %v611_v52 = vadd.s32 80, %v1697_v25  ;;  %v627_v53 = vadd.s32 208, %v1697_v25  ;;  %v609_v54 = vadd.s32 64, %v1697_v25  ;;  %v625_v55 = vadd.s32 192, %v1697_v25  ;;  %p1430_p3 = por %p1429_p13, %p1428_p10 }
  0x61   : > { %vm666_vm2 = vcmp.lt.s32.totalorder %v1719_v38, 16  ;;  %vm682_vm3 = vcmp.lt.s32.totalorder %v1722_v39, 16  ;;  %vm669_vm4 = vcmp.lt.s32.totalorder %v1725_v40, 16  ;;  %vm685_vm5 = vcmp.lt.s32.totalorder %v1728_v41, 16 }
  0x62   : > { %v612_v56 = vadd.s32 88, %v1697_v25  ;;  %v628_v57 = vadd.s32 216, %v1697_v25  ;;  %v610_v58 = vadd.s32 72, %v1697_v25  ;;  %v626_v59 = vadd.s32 200, %v1697_v25  ;;  %p1431_p7 = pnand %p1430_p3, %p1424_p8 }
  0x63   : > { %1221 = vmatpush3.bf16.msra.mxu0 %v1342_v3  ;;  %1273 = vmatpush3.bf16.msra.mxu1 %v1342_v3  ;;  %vm667_vm6 = vcmp.lt.s32.totalorder %v1731_v42, 16  ;;  %vm683_vm7 = vcmp.lt.s32.totalorder %v1734_v43, 16  ;;  %v1765_v60 = vadd.s32 %v1701_v27, %v605_v44  ;;  %v1768_v61 = vadd.s32 %v1701_v27, %v621_v45 }
  0x64   : > { %1222 = vmatprep.subr.bf16.mxu0 %v1343_v6  ;;  %1266 = vmatprep.subr.bf16.mxu1 %v1343_v6  ;;  %v1771_v62 = vadd.s32 %v1701_v27, %v608_v46  ;;  %v1774_v63 = vadd.s32 %v1701_v27, %v624_v47  ;;  %v1782_v1 = vadd.s32 %v1701_v27, %v606_v50  ;;  %v615_v3 = vadd.s32 112, %v1697_v25 }
  0x65   : > { %v1785_v2 = vadd.s32 %v1701_v27, %v622_v51  ;;  %v631_v4 = vadd.s32 240, %v1697_v25  ;;  %v1790_v5 = vadd.s32 %v1701_v27, %v611_v52  ;;  %vm672_vm8 = vcmp.lt.s32.totalorder %v1741_v48, 16 }
  0x66   : > { %v1820_v26 = vadd.s32 %v1701_v27, %v615_v3  ;;  %vm688_vm9 = vcmp.lt.s32.totalorder %v1744_v49, 16  ;;  %vm670_vm10 = vcmp.lt.s32.totalorder %v1765_v60, 16  ;;  %vm686_vm11 = vcmp.lt.s32.totalorder %v1768_v61, 16 }
  0x67   : > { %1223 = vmatpush3.bf16.msra.mxu0 %v1343_v6  ;;  %1274 = vmatpush3.bf16.msra.mxu1 %v1343_v6  ;;  %v1793_v6 = vadd.s32 %v1701_v27, %v627_v53  ;;  %v1823_v28 = vadd.s32 %v1701_v27, %v631_v4  ;;  %vm673_vm12 = vcmp.lt.s32.totalorder %v1771_v62, 16  ;;  %vm689_vm13 = vcmp.lt.s32.totalorder %v1774_v63, 16 }
  0x68   : > { %1224 = vmatprep.subr.bf16.mxu0 %v1344_v7  ;;  %1267 = vmatprep.subr.bf16.mxu1 %v1344_v7  ;;  %vm671_vm14 = vcmp.lt.s32.totalorder %v1782_v1, 16  ;;  %vm687_vm15 = vcmp.lt.s32.totalorder %v1785_v2, 16  ;;  %v1838_v51 = vadd.s32 120, %v1697_v25  ;;  %v1841_v52 = vadd.s32 248, %v1697_v25 }
  0x6b   : > { %1225 = vmatpush3.bf16.msra.mxu0 %v1344_v7  ;;  %1275 = vmatpush3.bf16.msra.mxu1 %v1344_v7  ;;  %v1796_v7 = vadd.s32 %v1701_v27, %v609_v54 }
  0x6c   : > { %1226 = vmatprep.subr.bf16.mxu0 %v1345_v8  ;;  %1268 = vmatprep.subr.bf16.mxu1 %v1345_v8 }
  0x6f   : > { %1227 = vmatpush3.bf16.msra.mxu0 %v1345_v8  ;;  %1276 = vmatpush3.bf16.msra.mxu1 %v1345_v8  ;;  %v1799_v8 = vadd.s32 %v1701_v27, %v625_v55 }
  0x70   : > { %1228 = vmatprep.subr.bf16.mxu0 %v1346_v9  ;;  %1269 = vmatprep.subr.bf16.mxu1 %v1346_v9 }
  0x73   : > { %1229 = vmatpush3.bf16.msra.mxu0 %v1346_v9  ;;  %1277 = vmatpush3.bf16.msra.mxu1 %v1346_v9 }
  0x76   : > { %1231 = vmatmul.mubr.bf16.vlgmr.msra.gmra.mrb[0].mxu0 %v1349_v10  ;;  %1247 = vmatmul.mubr.bf16.vlgmr.msra.gmra.mrb[0].mxu1 %v1350_v11  ;;  %v1802_v11 = vadd.s32 %v1701_v27, %v612_v56 }
  0x77   : > { %1234 = vmatprep.mubr.bf16.mxu0 %v1351_v12  ;;  %1250 = vmatprep.mubr.bf16.mxu1 %v1352_v13  ;;  %v1805_v12 = vadd.s32 %v1701_v27, %v628_v57  ;;  %v1808_v13 = vadd.s32 %v1701_v27, %v610_v58 }
  0x7e   : > { %1235 = vmatmul.mubr.bf16.gmra.mrb[4].mxu0 %v1353_v14  ;;  %1251 = vmatmul.mubr.bf16.gmra.mrb[4].mxu1 %v1354_v15  ;;  %v1811_v14 = vadd.s32 %v1701_v27, %v626_v59 }
  0x7f   : > { %1238 = vmatprep.mubr.bf16.mxu0 %v1355_v16  ;;  %1254 = vmatprep.mubr.bf16.mxu1 %v1356_v17 }
  0x86   : > { %1239 = vmatmul.mubr.bf16.gmra.mrb[8].mxu0 %v1357_v18  ;;  %1255 = vmatmul.mubr.bf16.gmra.mrb[8].mxu1 %v1358_v19  ;;  %v613_v19 = vadd.s32 96, %v1697_v25 }
  0x87   : > { %1242 = vmatprep.mubr.bf16.mxu0 %v1359_v20  ;;  %1258 = vmatprep.mubr.bf16.mxu1 %v1360_v21  ;;  %v629_v20 = vadd.s32 224, %v1697_v25 }
  0x8e   : > { %1243 = vmatmul.mubr.bf16.gmra.mrb[12].mxu0 %v1361_v22  ;;  %1259 = vmatmul.mubr.bf16.gmra.mrb[12].mxu1 %v1362_v23 }
 0x149   : > { %v1232_v9 = vpop.f32.mrb[0].mxu0  ;;  %v1248_v10 = vpop.f32.mrb[0].mxu1 }
 0x14a   : > { %v449_v15 = vadd.f32 %v1232_v9, %v1779_v0  ;;  %v513_v16 = vadd.f32 %v1248_v10, %v1779_v0  ;;  %v440_v17 = vpop.f32.mrb[1].mxu0  ;;  %v504_v18 = vpop.f32.mrb[1].mxu1 }
 0x14b   : > { %v441_v21 = vadd.f32 %v1779_v0, %v440_v17  ;;  %v505_v22 = vadd.f32 %v1779_v0, %v504_v18  ;;  %v1233_v23 = vpop.f32.mrb[2].mxu0  ;;  %v1249_v24 = vpop.f32.mrb[2].mxu1 }
 0x14c   : > { %v569_v29 = vmax.f32 %v449_v15, 0.0  ;;  %v585_v30 = vmax.f32 %v513_v16, 0.0  ;;  %v452_v31 = vadd.f32 %v1233_v23, %v1779_v0  ;;  %v516_v32 = vadd.f32 %v1249_v24, %v1779_v0  ;;  %v443_v33 = vpop.f32.mrb[3].mxu0  ;;  %v507_v34 = vpop.f32.mrb[3].mxu1 }
 0x14d   : > { %v567_v35 = vmax.f32 %v441_v21, 0.0  ;;  %v583_v44 = vmax.f32 %v505_v22, 0.0  ;;  %v444_v45 = vadd.f32 %v1779_v0, %v443_v33  ;;  %v508_v46 = vadd.f32 %v1779_v0, %v507_v34 }
 0x14e   : > { %v570_v47 = vmax.f32 %v452_v31, 0.0  ;;  %v586_v50 = vmax.f32 %v516_v32, 0.0  ;;  %v700_v53 = vsel %vm668_vm0, %v569_v29, 0.0  ;;  %v716_v54 = vsel %vm684_vm1, %v585_v30, 0.0 }
 0x14f   : > { %v568_v55 = vmax.f32 %v444_v45, 0.0  ;;  %v584_v56 = vmax.f32 %v508_v46, 0.0  ;;  %v698_v57 = vsel %vm666_vm2, %v567_v35, 0.0  ;;  %v714_v58 = vsel %vm682_vm3, %v583_v44, 0.0 }
 0x150   : > { %v701_v59 = vsel %vm669_vm4, %v570_v47, 0.0  ;;  %v717_v3 = vsel %vm685_vm5, %v586_v50, 0.0  ;;  %v1870_v22 = vadd.s32 %v1701_v27, %v613_v19  ;;  %v1873_v23 = vadd.s32 %v1701_v27, %v629_v20 }
 0x151   : > { %v1103_v36 = vpack.c.bf16 %v701_v59, %v700_v53  ;;  %v1143_v4 = vpack.c.bf16 %v717_v3, %v716_v54  ;;  %v699_v37 = vsel %vm667_vm6, %v568_v55, 0.0  ;;  %v715_v9 = vsel %vm683_vm7, %v584_v56, 0.0  ;;  %v1236_v38 = vpop.f32.mrb[4].mxu0  ;;  %v1252_v10 = vpop.f32.mrb[4].mxu1 }
 0x152   : > { %v1098_v15 = vpack.c.bf16 %v699_v37, %v698_v57  ;;  %v1138_v39 = vpack.c.bf16 %v715_v9, %v714_v58  ;;  %v465_v16 = vadd.f32 %v1236_v38, %v1779_v0  ;;  %v529_v40 = vadd.f32 %v1252_v10, %v1779_v0  ;;  %v456_v17 = vpop.f32.mrb[5].mxu0  ;;  %v520_v18 = vpop.f32.mrb[5].mxu1 }
 0x153   : > { %1175 = vst [vmem:[%s1863_s9 + $0x8] sm:$0xff] %v1103_v36   ;;  %1183 = vst [vmem:[%s1863_s9 + $0x48] sm:$0xff] %v1143_v4   ;;  %v457_v41 = vadd.f32 %v1779_v0, %v456_v17  ;;  %v521_v42 = vadd.f32 %v1779_v0, %v520_v18  ;;  %v1237_v43 = vpop.f32.mrb[6].mxu0  ;;  %v1253_v21 = vpop.f32.mrb[6].mxu1  ;;  %vm676_vm0 = vcmp.lt.s32.totalorder %v1790_v5, 16  ;;  %vm692_vm1 = vcmp.lt.s32.totalorder %v1793_v6, 16 }
 0x154   : > { %1099 = vst [vmem:[%s1863_s9] sm:$0xff] %v1098_v15   ;;  %1182 = vst [vmem:[%s1863_s9 + $0x40] sm:$0xff] %v1138_v39   ;;  %v573_v24 = vmax.f32 %v465_v16, 0.0  ;;  %v589_v29 = vmax.f32 %v529_v40, 0.0  ;;  %v468_v30 = vadd.f32 %v1237_v43, %v1779_v0  ;;  %v532_v31 = vadd.f32 %v1253_v21, %v1779_v0  ;;  %v459_v32 = vpop.f32.mrb[7].mxu0  ;;  %v523_v33 = vpop.f32.mrb[7].mxu1 }
 0x155   : > { %v571_v34 = vmax.f32 %v457_v41, 0.0  ;;  %v587_v19 = vmax.f32 %v521_v42, 0.0  ;;  %v460_v35 = vadd.f32 %v1779_v0, %v459_v32  ;;  %v524_v20 = vadd.f32 %v1779_v0, %v523_v33 }
 0x156   : > { %vm674_vm2 = vcmp.lt.s32.totalorder %v1796_v7, 16  ;;  %vm690_vm3 = vcmp.lt.s32.totalorder %v1799_v8, 16  ;;  %vm677_vm4 = vcmp.lt.s32.totalorder %v1802_v11, 16  ;;  %vm693_vm5 = vcmp.lt.s32.totalorder %v1805_v12, 16 }
 0x157   : > { %v574_v44 = vmax.f32 %v468_v30, 0.0  ;;  %v590_v45 = vmax.f32 %v532_v31, 0.0  ;;  %vm675_vm6 = vcmp.lt.s32.totalorder %v1808_v13, 16  ;;  %vm691_vm7 = vcmp.lt.s32.totalorder %v1811_v14, 16 }
 0x158   : > { %v614_v46 = vadd.s32 104, %v1697_v25  ;;  %v630_v47 = vadd.s32 232, %v1697_v25  ;;  %v704_v50 = vsel %vm672_vm8, %v573_v24, 0.0  ;;  %v720_v53 = vsel %vm688_vm9, %v589_v29, 0.0 }
 0x159   : > { %v572_v54 = vmax.f32 %v460_v35, 0.0  ;;  %v588_v55 = vmax.f32 %v524_v20, 0.0  ;;  %v702_v56 = vsel %vm670_vm10, %v571_v34, 0.0  ;;  %v718_v57 = vsel %vm686_vm11, %v587_v19, 0.0  ;;  %v1240_v3 = vpop.f32.mrb[8].mxu0  ;;  %v1256_v61 = vpop.f32.mrb[8].mxu1 }
 0x15a   : > { %v705_v58 = vsel %vm673_vm12, %v574_v44, 0.0  ;;  %v721_v25 = vsel %vm689_vm13, %v590_v45, 0.0  ;;  %v481_v62 = vadd.f32 %v1240_v3, %v1779_v0  ;;  %v545_v37 = vadd.f32 %v1256_v61, %v1779_v0  ;;  %v472_v63 = vpop.f32.mrb[9].mxu0  ;;  %v536_v9 = vpop.f32.mrb[9].mxu1 }
 0x15b   : > { %v1113_v48 = vpack.c.bf16 %v705_v58, %v704_v50  ;;  %v1153_v59 = vpack.c.bf16 %v721_v25, %v720_v53  ;;  %v703_v49 = vsel %vm671_vm14, %v572_v54, 0.0  ;;  %v719_v60 = vsel %vm687_vm15, %v588_v55, 0.0  ;;  %v1241_v2 = vpop.f32.mrb[10].mxu0  ;;  %v1257_v10 = vpop.f32.mrb[10].mxu1 }
 0x15c   : > { %v1108_v36 = vpack.c.bf16 %v703_v49, %v702_v56  ;;  %v1148_v4 = vpack.c.bf16 %v719_v60, %v718_v57  ;;  %v473_v1 = vadd.f32 %v1779_v0, %v472_v63  ;;  %v537_v38 = vadd.f32 %v1779_v0, %v536_v9  ;;  %v475_v41 = vpop.f32.mrb[11].mxu0  ;;  %v539_v42 = vpop.f32.mrb[11].mxu1 }
 0x15d   : > { %1177 = vst [vmem:[%s1863_s9 + $0x18] sm:$0xff] %v1113_v48   ;;  %1185 = vst [vmem:[%s1863_s9 + $0x58] sm:$0xff] %v1153_v59   ;;  %v1915_v15 = vadd.s32 %v1701_v27, %v1838_v51  ;;  %v1919_v39 = vadd.s32 %v1701_v27, %v1841_v52  ;;  %v577_v16 = vmax.f32 %v481_v62, 0.0  ;;  %v593_v40 = vmax.f32 %v545_v37, 0.0 }
 0x15e   : > { %1176 = vst [vmem:[%s1863_s9 + $0x10] sm:$0xff] %v1108_v36   ;;  %1184 = vst [vmem:[%s1863_s9 + $0x50] sm:$0xff] %v1148_v4   ;;  %v484_v17 = vadd.f32 %v1241_v2, %v1779_v0  ;;  %v548_v18 = vadd.f32 %v1257_v10, %v1779_v0  ;;  %vm680_vm8 = vcmp.lt.s32.totalorder %v1820_v26, 16  ;;  %vm696_vm9 = vcmp.lt.s32.totalorder %v1823_v28, 16 }
 0x15f   : > { %v575_v51 = vmax.f32 %v473_v1, 0.0  ;;  %v591_v43 = vmax.f32 %v537_v38, 0.0  ;;  %v476_v21 = vadd.f32 %v1779_v0, %v475_v41  ;;  %v540_v52 = vadd.f32 %v1779_v0, %v539_v42 }
 0x160   : > { %vm678_vm10 = vcmp.lt.s32.totalorder %v1870_v22, 16  ;;  %vm694_vm11 = vcmp.lt.s32.totalorder %v1873_v23, 16  ;;  %v578_v24 = vmax.f32 %v484_v17, 0.0  ;;  %v594_v29 = vmax.f32 %v548_v18, 0.0 }
 0x161   : > { %v647_v30 = vadd.s32 %v1701_v27, %v614_v46  ;;  %v663_v31 = vadd.s32 %v1701_v27, %v630_v47  ;;  %v708_v32 = vsel %vm676_vm0, %v577_v16, 0.0  ;;  %v724_v33 = vsel %vm692_vm1, %v593_v40, 0.0  ;;  %v1244_v46 = vpop.f32.mrb[12].mxu0  ;;  %v1260_v8 = vpop.f32.mrb[12].mxu1 }
 0x162   : > { %v576_v34 = vmax.f32 %v476_v21, 0.0  ;;  %v592_v19 = vmax.f32 %v540_v52, 0.0  ;;  %v706_v35 = vsel %vm674_vm2, %v575_v51, 0.0  ;;  %v722_v20 = vsel %vm690_vm3, %v591_v43, 0.0  ;;  %v488_v12 = vpop.f32.mrb[13].mxu0  ;;  %v552_v54 = vpop.f32.mrb[13].mxu1 }
 0x163   : > { %v709_v44 = vsel %vm677_vm4, %v578_v24, 0.0  ;;  %v725_v27 = vsel %vm693_vm5, %v594_v29, 0.0  ;;  %v497_v11 = vadd.f32 %v1244_v46, %v1779_v0  ;;  %v561_v53 = vadd.f32 %v1260_v8, %v1779_v0  ;;  %v1245_v14 = vpop.f32.mrb[14].mxu0  ;;  %v1261_v56 = vpop.f32.mrb[14].mxu1 }
 0x164   : > { %v1123_v5 = vpack.c.bf16 %v709_v44, %v708_v32  ;;  %v1163_v45 = vpack.c.bf16 %v725_v27, %v724_v33  ;;  %v707_v6 = vsel %vm675_vm6, %v576_v34, 0.0  ;;  %v723_v7 = vsel %vm691_vm7, %v592_v19, 0.0  ;;  %v491_v59 = vpop.f32.mrb[15].mxu0  ;;  %v555_v49 = vpop.f32.mrb[15].mxu1 }
 0x165   : > { %v1118_v47 = vpack.c.bf16 %v707_v6, %v706_v35  ;;  %v1158_v50 = vpack.c.bf16 %v723_v7, %v722_v20  ;;  %v489_v13 = vadd.f32 %v1779_v0, %v488_v12  ;;  %v553_v55 = vadd.f32 %v1779_v0, %v552_v54 }
 0x166   : > { %1179 = vst [vmem:[%s1863_s9 + $0x28] sm:$0xff] %v1123_v5   ;;  %1187 = vst [vmem:[%s1863_s9 + $0x68] sm:$0xff] %v1163_v45   ;;  %vm681_vm12 = vcmp.lt.s32.totalorder %v1915_v15, 16  ;;  %vm697_vm13 = vcmp.lt.s32.totalorder %v1919_v39, 16  ;;  %v581_v57 = vmax.f32 %v497_v11, 0.0  ;;  %v597_v58 = vmax.f32 %v561_v53, 0.0 }
 0x167   : > { %1178 = vst [vmem:[%s1863_s9 + $0x20] sm:$0xff] %v1118_v47   ;;  %1186 = vst [vmem:[%s1863_s9 + $0x60] sm:$0xff] %v1158_v50   ;;  %v500_v25 = vadd.f32 %v1245_v14, %v1779_v0  ;;  %v564_v48 = vadd.f32 %v1261_v56, %v1779_v0  ;;  %v579_v60 = vmax.f32 %v489_v13, 0.0  ;;  %v595_v3 = vmax.f32 %v553_v55, 0.0 }
 0x168   : > { %v492_v61 = vadd.f32 %v1779_v0, %v491_v59  ;;  %v556_v36 = vadd.f32 %v1779_v0, %v555_v49  ;;  %vm679_vm14 = vcmp.lt.s32.totalorder %v647_v30, 16  ;;  %vm695_vm15 = vcmp.lt.s32.totalorder %v663_v31, 16 }
 0x169   : > { %v582_v4 = vmax.f32 %v500_v25, 0.0  ;;  %v598_v62 = vmax.f32 %v564_v48, 0.0  ;;  %v712_v37 = vsel %vm680_vm8, %v581_v57, 0.0  ;;  %v728_v63 = vsel %vm696_vm9, %v597_v58, 0.0 }
 0x16a   : > { %v580_v9 = vmax.f32 %v492_v61, 0.0  ;;  %v596_v1 = vmax.f32 %v556_v36, 0.0  ;;  %v710_v0 = vsel %vm678_vm10, %v579_v60, 0.0  ;;  %v726_v38 = vsel %vm694_vm11, %v595_v3, 0.0 }
 0x16b   : > { %v713_v26 = vsel %vm681_vm12, %v582_v4, 0.0  ;;  %v729_v28 = vsel %vm697_vm13, %v598_v62, 0.0 }
 0x16c   : > { %v1133_v2 = vpack.c.bf16 %v713_v26, %v712_v37  ;;  %v1173_v10 = vpack.c.bf16 %v729_v28, %v728_v63  ;;  %v711_v16 = vsel %vm679_vm14, %v580_v9, 0.0  ;;  %v727_v40 = vsel %vm695_vm15, %v596_v1, 0.0 }
 0x16d   : > { %v1128_v22 = vpack.c.bf16 %v711_v16, %v710_v0  ;;  %v1168_v23 = vpack.c.bf16 %v727_v40, %v726_v38 }
 0x16e   : > { %1181 = vst [vmem:[%s1863_s9 + $0x38] sm:$0xff] %v1133_v2   ;;  %1189 = vst [vmem:[%s1863_s9 + $0x78] sm:$0xff] %v1173_v10  }
 0x16f   : > { %1180 = vst [vmem:[%s1863_s9 + $0x30] sm:$0xff] %v1128_v22   ;;  %1188 = vst [vmem:[%s1863_s9 + $0x70] sm:$0xff] %v1168_v23  }
 0x170   : > { %1434 = shalt.err (!%p1431_p7)
}
 0x171   : > { %s1435_s22 = scalar_lea.hbm %s1980_s11, 2048  ;;  %s1439_s26 = scalar_lea.hbm %s2033_s3, 4096 }
 0x172   : > { %p1436_p9 = scmp.ne.s32.totalorder %s1980_s11, %s1435_s22  ;;  %p1440_p5 = scmp.lt.u32.totalorder %s1980_s11, %s2033_s3 }
 0x173   : > { %p1441_p11 = scmp.lt.u32.totalorder %s1439_s26, %s1435_s22  ;;  %p1443_p4 = scmp.lt.u32.totalorder %s1435_s22, %s1980_s11 }
 0x174   : > { %p1437_p1 = pnand %p1436_p9, %p1614_p12 }
 0x175   : > { %p1442_p2 = por %p1441_p11, %p1440_p5 }
 0x176   : > { %p1438_p0 = pneg %p1437_p1 }
 0x177   : > { %p1444_p6 = por %p1443_p4, %p1442_p2 }
 0x179   : > { %p1445_p8 = pnand %p1444_p6, %p1438_p0 }
 0x17b   : > { %1448 = shalt.err (!%p1445_p8)
}
 0x17c   : > { %s1498_s8 = smov 64   ;;  %s1499_s9 = smov 4  }
 0x17d   : > { %1284 = dma.vmem_to_hbm [thread:$0]  (%p1614_p12), %s1982_s25, 2048, %s1980_s11, %s891_s27, %s1498_s8, %s1498_s8, %s1499_s9  }
 0x17e PF: > { %s919_s4 = sand.u32 1, %s1479_s12   ;;  %p2048_p10 = scmp.ne.s32.totalorder %s2038_s19, 0 }
 0x17f   : > { %p2049_p13 = scmp.ge.s32.totalorder %s1491_s15, 2  ;;  %s920_s16 = scalar_lea.sflag [#allocation4], %s919_s4 }
 0x181   : > { %p1295_p3 = pnand %p2049_p13, %p2048_p10 }
 0x183   : > { %1474 = dma.done.wait (!%p1295_p3), %s920_s16, 2048  }
 0x184   : > { %1476 = vsyncadd (!%p1295_p3), %s920_s16, 4294965248  ;;  %p17_p7 = scmp.ge.s32.totalorder %s1576_s24, 4   ;;  %s2050_s12 = smov %s1483_s13 }
 0x185   : > { %s2051_s13 = smov %s1487_s14  ;;  %s2052_s14 = smov %s1610_s17 }
 0x186   : > { %s2053_s15 = smov %s1576_s24  ;;  %19 = sbr.rel (!%p17_p7) target bundleno = 6 (0x6), region = 81 }
 0x18d   :  { %925 = vsyncpa [#allocation3], 1 }
 0x18e   :  { %927 = vsyncpa [#allocation3 + $0x1], 1 }
 0x18f   :  { %928 = vsyncpa [#allocation6], 1 }
 0x190   :  { %929 = vsyncpa [#allocation4], 1 }
 0x191   :  { %931 = vsyncpa [#allocation4 + $0x1], 1 }

</bundles_post_ra>
